<compile_context>
chip_gen: v7x
topology: tpu7x:2x2x1
jax: 0.10.0
libtpu: 0.0.40
codegen_flags: <defaults>
</compile_context>

<pallas_src>
import functools

import jax
import jax.numpy as jnp
from jax.experimental import pallas as pl
from jax.experimental.pallas import tpu as pltpu


def _round_up(x, m):
    return ((x + m - 1) // m) * m


# ---------------------------------------------------------------------------
# Kernel 1: feature transform   HW = H @ W   (tiled over node rows, parallel)
# ---------------------------------------------------------------------------
def _feat_transform_kernel(h_ref, w_ref, o_ref):
    o_ref[...] = jnp.dot(
        h_ref[...], w_ref[...], preferred_element_type=jnp.float32
    ).astype(o_ref.dtype)


def feature_transform(h, w, *, tile_m, out_dtype=jnp.bfloat16):
    n_pad, f_in = h.shape
    f_out = w.shape[1]
    grid = (n_pad // tile_m,)
    return pl.pallas_call(
        _feat_transform_kernel,
        out_shape=jax.ShapeDtypeStruct((n_pad, f_out), out_dtype),
        grid=grid,
        in_specs=[
            pl.BlockSpec((tile_m, f_in), lambda i: (i, 0)),   # H rows
            pl.BlockSpec((f_in, f_out), lambda i: (0, 0)),    # W (resident)
        ],
        out_specs=pl.BlockSpec((tile_m, f_out), lambda i: (i, 0)),
        compiler_params=pltpu.CompilerParams(
            dimension_semantics=("parallel",)),
        cost_estimate=pl.CostEstimate(
            flops=2 * n_pad * f_in * f_out,
            transcendentals=0,
            bytes_accessed=int(h.size * h.dtype.itemsize
                               + w.size * w.dtype.itemsize
                               + n_pad * f_out * jnp.dtype(out_dtype).itemsize),
        ),
    )(h, w)


# ---------------------------------------------------------------------------
# Kernel 2: aggregation   out = act(A_norm @ HW + b)
#   grid = (row tiles [parallel], A-column / reduction tiles [arbitrary])
#   f32 VMEM accumulator, init at k==0, bias+ReLU epilogue + store at k==last.
# ---------------------------------------------------------------------------
def _aggregate_kernel(a_ref, hw_ref, b_ref, o_ref, acc_ref, *, apply_act):
    k = pl.program_id(1)

    @pl.when(k == 0)
    def _():
        acc_ref[...] = jnp.zeros_like(acc_ref)

    acc_ref[...] += jnp.dot(
        a_ref[...], hw_ref[...], preferred_element_type=jnp.float32)

    @pl.when(k == pl.num_programs(1) - 1)
    def _():
        z = acc_ref[...] + b_ref[...]          # f32 epilogue (v5e-friendly)
        if apply_act:
            z = jnp.maximum(z, 0.0)
        o_ref[...] = z.astype(o_ref.dtype)


def aggregate(a, hw, b, *, tile_m, tile_k, apply_act, out_dtype):
    n_pad = a.shape[0]
    f_out = hw.shape[1]
    grid = (n_pad // tile_m, n_pad // tile_k)
    kernel = functools.partial(_aggregate_kernel, apply_act=apply_act)
    return pl.pallas_call(
        kernel,
        out_shape=jax.ShapeDtypeStruct((n_pad, f_out), out_dtype),
        grid=grid,
        in_specs=[
            pl.BlockSpec((tile_m, tile_k), lambda i, k: (i, k)),  # A tile
            pl.BlockSpec((tile_k, f_out), lambda i, k: (k, 0)),   # HW tile
            pl.BlockSpec((1, f_out), lambda i, k: (0, 0)),        # bias (full)
        ],
        out_specs=pl.BlockSpec((tile_m, f_out), lambda i, k: (i, 0)),
        scratch_shapes=[pltpu.VMEM((tile_m, f_out), jnp.float32)],
        compiler_params=pltpu.CompilerParams(
            dimension_semantics=("parallel", "arbitrary")),
        cost_estimate=pl.CostEstimate(
            flops=2 * n_pad * n_pad * f_out,
            transcendentals=0,
            bytes_accessed=int(a.size * a.dtype.itemsize
                               + hw.size * hw.dtype.itemsize * (n_pad // tile_m)
                               + n_pad * f_out * jnp.dtype(out_dtype).itemsize),
        ),
    )(a, hw, b)


# ---------------------------------------------------------------------------
# Encoder forward (glue): stack of GCN layers
# ---------------------------------------------------------------------------
def encoder_forward(a_norm, features, weights, biases):
    """Equivalent of Encoder.forward(features, g=None, corrupt=False)."""
    n, f_in = features.shape
    f_final = weights[-1].shape[1]

    # Tile / padding selection: lane-dense (mult of 128), tiles that fit every
    # generation's VMEM (bf16 512x512 A tile = 512 KiB, 1 MiB double-buffered).
    n_pad = _round_up(n, 128)
    tile = min(512, n_pad)
    n_pad = _round_up(n_pad, tile)

    # Pad + cast once; A_norm reused (bf16) by every layer.
    a_p = jnp.pad(a_norm, ((0, n_pad - n), (0, n_pad - n))).astype(jnp.bfloat16)

    f_in_pad = _round_up(f_in, 128)
    h = jnp.pad(features,
                ((0, n_pad - n), (0, f_in_pad - f_in))).astype(jnp.bfloat16)

    num_layers = len(weights)
    for i, (w, b) in enumerate(zip(weights, biases)):
        fi, fo = w.shape
        fi_p, fo_p = _round_up(fi, 128), _round_up(fo, 128)
        w_p = jnp.pad(w, ((0, fi_p - fi), (0, fo_p - fo))).astype(jnp.bfloat16)
        b_p = jnp.pad(b.reshape(1, -1),
                      ((0, 0), (0, fo_p - fo))).astype(jnp.float32)

        last = (i == num_layers - 1)
        hw = feature_transform(h, w_p, tile_m=tile, out_dtype=jnp.bfloat16)
        # dropout between layers is identity at inference time
        h = aggregate(a_p, hw, b_p,
                      tile_m=tile, tile_k=tile,
                      apply_act=not last,
                      out_dtype=jnp.float32 if last else jnp.bfloat16)

    return h[:n, :f_final]


# ---------------------------------------------------------------------------
# Parameter / graph construction (deterministic, synthetic)
# ---------------------------------------------------------------------------
def make_normalized_adjacency(key, n_nodes, edge_prob=0.1):
    # random symmetric graph + self-loops, norm='both' (D^-1/2 (A+I) D^-1/2)
    m = jax.random.uniform(key, (n_nodes, n_nodes)) < edge_prob
    m = jnp.logical_or(m, m.T)
    a = m.astype(jnp.float32) + jnp.eye(n_nodes, dtype=jnp.float32)
    a = jnp.minimum(a, 1.0)
    deg = a.sum(axis=1)
    d_inv_sqrt = 1.0 / jnp.sqrt(deg)
    return a * d_inv_sqrt[:, None] * d_inv_sqrt[None, :]


def make_gcn_params(key, in_feats, n_hidden, n_layers):
    """(n_layers + 1) GraphConv layers, Glorot-style deterministic init."""
    dims = [in_feats] + [n_hidden] * (n_layers + 1)
    weights, biases = [], []
    for i in range(len(dims) - 1):
        key, wk = jax.random.split(key)
        fan_in, fan_out = dims[i], dims[i + 1]
        scale = jnp.sqrt(6.0 / (fan_in + fan_out))
        w = jax.random.uniform(wk, (fan_in, fan_out), jnp.float32,
                               minval=-scale, maxval=scale)
        b = jnp.zeros((1, fan_out), jnp.float32)
        weights.append(w)
        biases.append(b)
    return weights, biases


if __name__ == "__main__":
    # Small shapes consistent with the module: N nodes, in_feats, n_hidden.
    N_NODES = 128
    IN_FEATS = 32
    N_HIDDEN = 32
    N_LAYERS = 1          # -> 2 GraphConv layers total (input + output)

    key = jax.random.PRNGKey(0)
    k_adj, k_feat, k_par = jax.random.split(key, 3)

    a_norm = make_normalized_adjacency(k_adj, N_NODES)
    features = jax.random.normal(k_feat, (N_NODES, IN_FEATS), jnp.float32)
    weights, biases = make_gcn_params(k_par, IN_FEATS, N_HIDDEN, N_LAYERS)

    out = encoder_forward(a_norm, features, weights, biases)
    out = jax.block_until_ready(out)

    # sanity: f32 reference in plain jnp (kernel uses bf16 inputs with f32
    # accumulation -> relaxed tolerance)
    h_ref = features
    for i, (w, b) in enumerate(zip(weights, biases)):
        z = a_norm @ (h_ref @ w) + b
        h_ref = jnp.maximum(z, 0.0) if i < len(weights) - 1 else z
    assert out.shape == (N_NODES, N_HIDDEN)
    assert jnp.allclose(out, h_ref, atol=5e-2, rtol=5e-2), \
        float(jnp.max(jnp.abs(out - h_ref)))

    print("KERNEL_OK")
</pallas_src>

<mosaic_0001>
module attributes {stable_mosaic.version = 11 : i64} {
  func.func @_feat_transform_kernel(%arg0: i32, %arg1: memref<128x128xbf16, #tpu.memory_space<vmem>>, %arg2: memref<128x128xbf16, #tpu.memory_space<vmem>>, %arg3: memref<128x128xbf16, #tpu.memory_space<vmem>>) attributes {dimension_semantics = [#tpu.dimension_semantics<parallel>], iteration_bounds = array<i64: 1>, scalar_prefetch = 0 : i64, scratch_operands = 0 : i64, tpu.core_type = #tpu.core_type<tc>, window_params = [{transform_indices = @transform_0, window_bounds = array<i64: 128, 128>}, {pipeline_mode = #tpu.pipeline_mode<synchronous>, transform_indices = @transform_1, window_bounds = array<i64: 128, 128>}, {transform_indices = @transform_2, window_bounds = array<i64: 128, 128>}]} {
    %c0 = arith.constant 0 : index
    %c0_0 = arith.constant 0 : index
    %0 = vector.load %arg1[%c0, %c0_0] : memref<128x128xbf16, #tpu.memory_space<vmem>>, vector<128x128xbf16>
    %c0_1 = arith.constant 0 : index
    %c0_2 = arith.constant 0 : index
    %1 = vector.load %arg2[%c0_1, %c0_2] : memref<128x128xbf16, #tpu.memory_space<vmem>>, vector<128x128xbf16>
    %cst = arith.constant dense<0.000000e+00> : vector<128x128xf32>
    %2 = tpu.matmul %0, %1, %cst {dimension_numbers = #tpu.dot_dimension_numbers<[1], [0], [0], [1], [0, 0, 1, 1], [], []>} : vector<128x128xbf16>, vector<128x128xbf16>, vector<128x128xf32> -> vector<128x128xf32>
    %3 = arith.truncf %2 : vector<128x128xf32> to vector<128x128xbf16>
    %c0_3 = arith.constant 0 : index
    %c0_4 = arith.constant 0 : index
    %4 = vector.load %arg3[%c0_3, %c0_4] : memref<128x128xbf16, #tpu.memory_space<vmem>>, vector<128x128xbf16>
    tpu.vector_store %arg3[%c0_3, %c0_4], %3 {strides = array<i32>} : memref<128x128xbf16, #tpu.memory_space<vmem>>, vector<128x128xbf16>,
    return
  }
  func.func @transform_0(%arg0: i32) -> (i32, i32) {
    %c0_i32 = arith.constant 0 : i32
    %c0_i32_0 = arith.constant 0 : i32
    return %arg0, %c0_i32 : i32, i32
  }
  func.func @transform_1(%arg0: i32) -> (i32, i32) {
    %c0_i32 = arith.constant 0 : i32
    %c0_i32_0 = arith.constant 0 : i32
    %c0_i32_1 = arith.constant 0 : i32
    return %c0_i32, %c0_i32_0 : i32, i32
  }
  func.func @transform_2(%arg0: i32) -> (i32, i32) {
    %c0_i32 = arith.constant 0 : i32
    %c0_i32_0 = arith.constant 0 : i32
    return %arg0, %c0_i32 : i32, i32
  }
}

</mosaic_0001>

<bundles_post_ra>
// kernel: tpu_custom_call.1
= control target key start
LH: loop header
LB: loop body
LE: loop exit
PB: predicated region body
PF: predicated region fallthrough
CT: control target
= control target key end

     0   :  { %7 = vsyncpa [#allocation3], 0  ;;  %s681_s0 = inlined_call_operand.hbm [shape: bf16[128,128], index: 0, kind: input, shape index: {}]   ;;  %s682_s1 = inlined_call_operand.hbm [shape: bf16[128,128], index: 1, kind: input, shape index: {}]   ;;  %s683_s2 = inlined_call_operand.hbm [shape: bf16[128,128], index: 2, kind: output, shape index: {}]  }
   0x1   :  { %8 = vsyncpa [#allocation6], 0 }
   0x2   :  { %9 = vsyncpa [#allocation4], 0  ;;  %s616_s9 = smov [#allocation2]   ;;  %s544_s13 = scalar_lea.hbm %s681_s0, 1024 }
   0x3   :  { %s15_s10 = sshll.u32 %s616_s9, 4  ;;  %p545_p0 = scmp.ne.s32.totalorder %s681_s0, %s544_s13  ;;  %s16_s10 = int_to_ptr.vmem [resolvable:$true] %s15_s10 }
   0x4   :  { %p548_p1 = scmp.lt.u32.totalorder %s544_s13, %s681_s0 }
   0x6   :  { %p550_p2 = pnand %p548_p1, %p545_p0 }
   0x8   :  { %553 = shalt.err (!%p550_p2)
}
   0x9   :  { %s554_s18 = scalar_lea.vmem %s16_s10, 1024  ;;  %p559_p4 = scmp.lt.s32.totalorder %s16_s10, %s16_s10 }
   0xa   :  { %p555_p3 = scmp.ne.s32.totalorder %s16_s10, %s554_s18  ;;  %p560_p5 = scmp.lt.s32.totalorder %s554_s18, %s554_s18 }
   0xc   :  { %p561_p6 = por %p560_p5, %p559_p4 }
   0xe   :  { %p562_p7 = pnand %p561_p6, %p555_p3 }
  0x10   :  { %565 = shalt.err (!%p562_p7)
}
  0x11   :  { %s617_s19 = smov 64   ;;  %s618_s20 = smov 4  }
  0x12   :  { %21 = dma.hbm_to_vmem [thread:$0]  %s681_s0, 1024, %s16_s10, [#allocation3], %s617_s19, %s617_s19, %s618_s20  }
  0x13   :  { %s619_s23 = smov [#allocation5]   ;;  %s566_s27 = scalar_lea.hbm %s682_s1, 1024 }
  0x14   :  { %s27_s24 = sshll.u32 %s619_s23, 4  ;;  %p567_p8 = scmp.ne.s32.totalorder %s682_s1, %s566_s27  ;;  %s28_s24 = int_to_ptr.vmem [resolvable:$true] %s27_s24 }
  0x15   :  { %p570_p9 = scmp.lt.u32.totalorder %s566_s27, %s682_s1 }
  0x17   :  { %p572_p10 = pnand %p570_p9, %p567_p8 }
  0x19   :  { %575 = shalt.err (!%p572_p10)
}
  0x1a   :  { %s576_s4 = scalar_lea.vmem %s28_s24, 1024  ;;  %p581_p12 = scmp.lt.s32.totalorder %s28_s24, %s28_s24 }
  0x1b   :  { %p577_p11 = scmp.ne.s32.totalorder %s28_s24, %s576_s4  ;;  %p582_p13 = scmp.lt.s32.totalorder %s576_s4, %s576_s4 }
  0x1d   :  { %p583_p0 = por %p582_p13, %p581_p12 }
  0x1f   :  { %p584_p1 = pnand %p583_p0, %p577_p11 }
  0x21   :  { %587 = shalt.err (!%p584_p1)
}
  0x22   :  { %33 = dma.hbm_to_vmem [thread:$0]  %s682_s1, 1024, %s28_s24, [#allocation6], %s617_s19, %s617_s19, %s618_s20  }
  0x23   :  { %610 = dma.done.wait [#allocation3], 1024  }
  0x24   :  { %611 = vsyncadd [#allocation3], 4294966272 }
  0x25   :  { %612 = dma.done.wait [#allocation6], 1024  }
  0x26   :  { %613 = vsyncadd [#allocation6], 4294966272  ;;  %v528_v0 = vld [vmem:[#allocation5] sm:$0xff]   ;;  %v529_v1 = vld [vmem:[#allocation5 + $0x8] sm:$0xff]   ;;  %s620_s1 = smov [#allocation7]  }
  0x27   :  { %475 = vmatprep.subr.bf16.mxu0 %v528_v0  ;;  %507 = vmatprep.subr.bf16.mxu1 %v528_v0  ;;  %v530_v2 = vld [vmem:[#allocation5 + $0x10] sm:$0xff]   ;;  %v531_v3 = vld [vmem:[#allocation5 + $0x18] sm:$0xff]   ;;  %v536_v4 = vld [vmem:[#allocation2] sm:$0xff]   ;;  %s351_s6 = sshll.u32 %s620_s1, 4  ;;  %s352_s6 = int_to_ptr.vmem [resolvable:$true] %s351_s6 }
  0x28   :  { %476 = vmatpush3.bf16.msra.mxu0 %v528_v0  ;;  %515 = vmatpush3.bf16.msra.mxu1 %v528_v0  ;;  %v537_v5 = vld [vmem:[#allocation2 + $0x20] sm:$0xff]   ;;  %v533_v7 = vld [vmem:[#allocation5 + $0x28] sm:$0xff]   ;;  %v534_v8 = vld [vmem:[#allocation5 + $0x30] sm:$0xff]   ;;  %s588_s7 = scalar_lea.vmem %s352_s6, 1024  ;;  %p593_p3 = scmp.lt.s32.totalorder %s352_s6, %s352_s6 }
  0x29   :  { %477 = vmatprep.subr.bf16.mxu0 %v529_v1  ;;  %508 = vmatprep.subr.bf16.mxu1 %v529_v1  ;;  %v532_v6 = vld [vmem:[#allocation5 + $0x20] sm:$0xff]   ;;  %v535_v9 = vld [vmem:[#allocation5 + $0x38] sm:$0xff]   ;;  %v538_v10 = vld [vmem:[#allocation2 + $0x8] sm:$0xff]   ;;  %p589_p2 = scmp.ne.s32.totalorder %s352_s6, %s588_s7  ;;  %p594_p4 = scmp.lt.s32.totalorder %s588_s7, %s588_s7 }
  0x2a   :  { %491 = vmatprep.mubr.bf16.mxu0 %v536_v4  ;;  %499 = vmatprep.mubr.bf16.mxu1 %v537_v5  ;;  %v539_v11 = vld [vmem:[#allocation2 + $0x28] sm:$0xff]   ;;  %v540_v12 = vld [vmem:[#allocation2 + $0x10] sm:$0xff]   ;;  %v542_v14 = vld [vmem:[#allocation2 + $0x18] sm:$0xff]  }
  0x2b   :  { %v541_v13 = vld [vmem:[#allocation2 + $0x30] sm:$0xff]   ;;  %v543_v15 = vld [vmem:[#allocation2 + $0x38] sm:$0xff]   ;;  %p595_p5 = por %p594_p4, %p593_p3 }
  0x2c   :  { %478 = vmatpush3.bf16.msra.mxu0 %v529_v1  ;;  %516 = vmatpush3.bf16.msra.mxu1 %v529_v1 }
  0x2d   :  { %479 = vmatprep.subr.bf16.mxu0 %v530_v2  ;;  %509 = vmatprep.subr.bf16.mxu1 %v530_v2  ;;  %p596_p6 = pnand %p595_p5, %p589_p2 }
  0x30   :  { %480 = vmatpush3.bf16.msra.mxu0 %v530_v2  ;;  %517 = vmatpush3.bf16.msra.mxu1 %v530_v2 }
  0x31   :  { %481 = vmatprep.subr.bf16.mxu0 %v531_v3  ;;  %510 = vmatprep.subr.bf16.mxu1 %v531_v3 }
  0x34   :  { %482 = vmatpush3.bf16.msra.mxu0 %v531_v3  ;;  %518 = vmatpush3.bf16.msra.mxu1 %v531_v3 }
  0x35   :  { %483 = vmatprep.subr.bf16.mxu0 %v532_v6  ;;  %511 = vmatprep.subr.bf16.mxu1 %v532_v6 }
  0x38   :  { %484 = vmatpush3.bf16.msra.mxu0 %v532_v6  ;;  %519 = vmatpush3.bf16.msra.mxu1 %v532_v6 }
  0x39   :  { %485 = vmatprep.subr.bf16.mxu0 %v533_v7  ;;  %512 = vmatprep.subr.bf16.mxu1 %v533_v7 }
  0x3c   :  { %486 = vmatpush3.bf16.msra.mxu0 %v533_v7  ;;  %520 = vmatpush3.bf16.msra.mxu1 %v533_v7 }
  0x3d   :  { %487 = vmatprep.subr.bf16.mxu0 %v534_v8  ;;  %513 = vmatprep.subr.bf16.mxu1 %v534_v8 }
  0x40   :  { %488 = vmatpush3.bf16.msra.mxu0 %v534_v8  ;;  %521 = vmatpush3.bf16.msra.mxu1 %v534_v8 }
  0x41   :  { %489 = vmatprep.subr.bf16.mxu0 %v535_v9  ;;  %514 = vmatprep.subr.bf16.mxu1 %v535_v9 }
  0x44   :  { %490 = vmatpush3.bf16.msra.mxu0 %v535_v9  ;;  %522 = vmatpush3.bf16.msra.mxu1 %v535_v9 }
  0x47   :  { %492 = vmatmul.mubr.bf16.vlgmr.msra.gmra.mrb[0].mxu0 %v538_v10  ;;  %500 = vmatmul.mubr.bf16.vlgmr.msra.gmra.mrb[0].mxu1 %v539_v11 }
  0x48   :  { %495 = vmatprep.mubr.bf16.mxu0 %v540_v12  ;;  %503 = vmatprep.mubr.bf16.mxu1 %v541_v13 }
  0x4f   :  { %496 = vmatmul.mubr.bf16.gmra.mrb[4].mxu0 %v542_v14  ;;  %504 = vmatmul.mubr.bf16.gmra.mrb[4].mxu1 %v543_v15 }
 0x11a   :  { %v493_v16 = vpop.f32.mrb[0].mxu0  ;;  %v501_v17 = vpop.f32.mrb[0].mxu1 }
 0x11b   :  { %v203_v18 = vpop.f32.mrb[1].mxu0  ;;  %v235_v19 = vpop.f32.mrb[1].mxu1 }
 0x11c   :  { %v494_v20 = vpop.f32.mrb[2].mxu0  ;;  %v502_v21 = vpop.f32.mrb[2].mxu1 }
 0x11d   :  { %v420_v22 = vpack.c.bf16 %v494_v20, %v493_v16  ;;  %v440_v23 = vpack.c.bf16 %v502_v21, %v501_v17  ;;  %v206_v24 = vpop.f32.mrb[3].mxu0  ;;  %v238_v25 = vpop.f32.mrb[3].mxu1 }
 0x11e   :  { %v415_v26 = vpack.c.bf16 %v206_v24, %v203_v18  ;;  %v435_v27 = vpack.c.bf16 %v238_v25, %v235_v19 }
 0x11f   :  { %452 = vst [vmem:[#allocation7 + $0x8] sm:$0xff] %v420_v22   ;;  %456 = vst [vmem:[#allocation7 + $0x28] sm:$0xff] %v440_v23  }
 0x120   :  { %416 = vst [vmem:[#allocation7] sm:$0xff] %v415_v26   ;;  %455 = vst [vmem:[#allocation7 + $0x20] sm:$0xff] %v435_v27  }
 0x122   :  { %v497_v28 = vpop.f32.mrb[4].mxu0  ;;  %v505_v29 = vpop.f32.mrb[4].mxu1 }
 0x123   :  { %v219_v30 = vpop.f32.mrb[5].mxu0  ;;  %v251_v31 = vpop.f32.mrb[5].mxu1 }
 0x124   :  { %v498_v32 = vpop.f32.mrb[6].mxu0  ;;  %v506_v33 = vpop.f32.mrb[6].mxu1 }
 0x125   :  { %v430_v34 = vpack.c.bf16 %v498_v32, %v497_v28  ;;  %v450_v35 = vpack.c.bf16 %v506_v33, %v505_v29  ;;  %v222_v36 = vpop.f32.mrb[7].mxu0  ;;  %v254_v37 = vpop.f32.mrb[7].mxu1 }
 0x126   :  { %v425_v38 = vpack.c.bf16 %v222_v36, %v219_v30  ;;  %v445_v39 = vpack.c.bf16 %v254_v37, %v251_v31 }
 0x127   :  { %454 = vst [vmem:[#allocation7 + $0x18] sm:$0xff] %v430_v34   ;;  %458 = vst [vmem:[#allocation7 + $0x38] sm:$0xff] %v450_v35  }
 0x128   :  { %453 = vst [vmem:[#allocation7 + $0x10] sm:$0xff] %v425_v38   ;;  %457 = vst [vmem:[#allocation7 + $0x30] sm:$0xff] %v445_v39  }
 0x129   :  { %599 = shalt.err (!%p596_p6)
}
 0x12a   :  { %s600_s10 = scalar_lea.hbm %s683_s2, 1024 }
 0x12b   :  { %p601_p7 = scmp.ne.s32.totalorder %s683_s2, %s600_s10  ;;  %p604_p8 = scmp.lt.u32.totalorder %s600_s10, %s683_s2 }
 0x12d   :  { %p606_p9 = pnand %p604_p8, %p601_p7 }
 0x12f   :  { %609 = shalt.err (!%p606_p9)
}
 0x130   :  { %357 = dma.vmem_to_hbm [thread:$0]  %s352_s6, 1024, %s683_s2, [#allocation4], %s617_s19, %s617_s19, %s618_s20  }
 0x131   :  { %614 = dma.done.wait [#allocation4], 1024  }
 0x132   :  { %615 = vsyncadd [#allocation4], 4294966272 }
 0x133   :  { %361 = vsyncpa [#allocation3], 1 }
 0x134   :  { %362 = vsyncpa [#allocation6], 1 }
 0x135   :  { %363 = vsyncpa [#allocation4], 1 }

</bundles_post_ra>
